<compile_context>
chip_gen: v5e
topology: v5e:2x2
jax: 0.10.0
libtpu: 0.0.40
codegen_flags: <defaults>
</compile_context>

<pallas_src>
import jax
import jax.numpy as jnp
from jax import lax
from jax.experimental import pallas as pl
from jax.experimental.pallas import tpu as pltpu


def _round_up(x, m):
    return ((x + m - 1) // m) * m


def _choose_tile_m(m_rows):
    """Largest row tile that amortizes per-step overhead but keeps >=2 grid
    steps (so v7x's 2 TensorCores can both be fed by the 'parallel' axis)."""
    for t in (2048, 1024, 512, 256, 128, 64, 32, 16, 8):
        if m_rows >= 2 * t:
            return t
    return 8


def _fused_embed_kernel(x_ref, w_ref, b_ref, o_ref):
    # x_ref : (TM, K)      bf16  patchified pixels
    # w_ref : (K, E_pad)   bf16  pre-fused (backbone @ proj) weight, lane-padded
    # b_ref : (1, E_pad)   f32   pre-fused bias, lane-padded
    # o_ref : (TM, E_pad)  bf16  (f32 accumulation, bf16 store)
    acc = jnp.dot(x_ref[...], w_ref[...], preferred_element_type=jnp.float32)
    o_ref[...] = (acc + b_ref[...]).astype(o_ref.dtype)


def prepare_params(params, patch):
    """One-time weight layout prep + host-side weight fusion (f32, exact)."""
    Wb, bb = params["backbone_w"], params["backbone_b"]   # (Cf, Cin, k, k), (Cf,)
    Wp, bp = params["proj_w"], params["proj_b"]           # (E, Cf, 1, 1),   (E,)
    Cf, Cin = Wb.shape[0], Wb.shape[1]
    E = Wp.shape[0]
    K = Cin * patch * patch
    E_pad = _round_up(E, 128)                              # lane-dense output

    wb_mat = Wb.reshape(Cf, K).T.astype(jnp.float32)       # (K, Cf)
    wp_mat = Wp.reshape(E, Cf).T.astype(jnp.float32)       # (Cf, E)

    # Fold the two linear ops into one matmul (exact in f32).
    w_fused = wb_mat @ wp_mat                              # (K, E)
    b_fused = bb.astype(jnp.float32) @ wp_mat + bp.astype(jnp.float32)  # (E,)

    w_fused = jnp.pad(w_fused, ((0, 0), (0, E_pad - E))).astype(jnp.bfloat16)
    b_fused = jnp.pad(b_fused, (0, E_pad - E)).reshape(1, E_pad).astype(jnp.float32)

    return {"w": w_fused, "b": b_fused, "E": E, "E_pad": E_pad, "K": K}


def hybrid_embed_forward(x_nchw, prepared, patch=2):
    """Forward pass of HybridEmbed with a patchify-conv backbone.

    x_nchw : (B, in_chans, H, W)  -- PyTorch NCHW convention
    returns: (B, num_patches, embed_dim)  bfloat16
    """
    w, b = prepared["w"], prepared["b"]
    E, E_pad, K = prepared["E"], prepared["E_pad"], prepared["K"]

    B, Cin, H, W = x_nchw.shape
    k = patch
    Hf, Wf = H // k, W // k
    N = Hf * Wf

    # ---- patchify: (B, Cin, Hf, k, Wf, k) -> (B*N, Cin*k*k) in bf16 ----
    xp = x_nchw.astype(jnp.bfloat16).reshape(B, Cin, Hf, k, Wf, k)
    xp = jnp.transpose(xp, (0, 2, 4, 1, 3, 5)).reshape(B * N, K)

    # ---- row tiling: fold batch into rows, pick a large MXU/DMA-friendly tile ----
    M = B * N
    TILE_M = _choose_tile_m(M)
    M_pad = _round_up(M, TILE_M)
    if M_pad != M:
        xp = jnp.pad(xp, ((0, M_pad - M), (0, 0)))

    out_bytes = 2  # bf16 store
    cost = pl.CostEstimate(
        flops=2 * M_pad * K * E_pad,
        transcendentals=0,
        bytes_accessed=(M_pad * K * 2 + K * E_pad * 2 + E_pad * 4
                        + M_pad * E_pad * out_bytes),
    )
    # VMEM budget: x tile + out tile double-buffered, plus (double-buffered)
    # constant weight/bias blocks.  Stays valid on v7x's 64 MiB VMEM and is
    # raised past v5e's 16 MiB scoped default if tile sizes are ever scaled up.
    # (Constant weight blocks could additionally be single-buffered via
    #  pipeline_mode=pl.Buffered(1); negligible at these weight sizes.)
    vmem_need = (2 * (TILE_M * K * 2 + TILE_M * E_pad * out_bytes)
                 + 2 * (K * E_pad * 2 + E_pad * 4))
    vmem_limit = int(min(max(32 * 1024 * 1024, 2 * vmem_need), 64 * 1024 * 1024))

    out_pad = pl.pallas_call(
        _fused_embed_kernel,
        out_shape=jax.ShapeDtypeStruct((M_pad, E_pad), jnp.bfloat16),
        grid_spec=pltpu.PrefetchScalarGridSpec(
            num_scalar_prefetch=0,
            grid=(M_pad // TILE_M,),
            in_specs=[
                pl.BlockSpec((TILE_M, K), lambda i: (i, 0)),
                pl.BlockSpec((K, E_pad), lambda i: (0, 0)),
                pl.BlockSpec((1, E_pad), lambda i: (0, 0)),
            ],
            out_specs=pl.BlockSpec((TILE_M, E_pad), lambda i: (i, 0)),
        ),
        compiler_params=pltpu.CompilerParams(
            dimension_semantics=("parallel",),   # row tiles shard over v7x's 2 TCs
            vmem_limit_bytes=vmem_limit),
        cost_estimate=cost,
    )(xp, w, b)

    # Depad only when actually required (demo uses embed_dim % 128 == 0 and
    # M % TILE_M == 0, so both slices below are no-ops and nothing is re-read).
    out = out_pad
    if M_pad != M:
        out = out[:M]
    if E_pad != E:
        out = out[:, :E]
    return out.reshape(B, N, E)


def _reference_forward(x_nchw, params, patch=2):
    """Pure-JAX f32 reference matching PyTorch semantics (NCHW convs)."""
    Wb, bb = params["backbone_w"], params["backbone_b"]
    Wp, bp = params["proj_w"], params["proj_b"]
    dn = lax.conv_dimension_numbers(x_nchw.shape, Wb.shape, ("NCHW", "OIHW", "NCHW"))
    feat = lax.conv_general_dilated(x_nchw, Wb, (patch, patch), "VALID",
                                    dimension_numbers=dn)
    feat = feat + bb[None, :, None, None]
    dn2 = lax.conv_dimension_numbers(feat.shape, Wp.shape, ("NCHW", "OIHW", "NCHW"))
    proj = lax.conv_general_dilated(feat, Wp, (1, 1), "VALID",
                                    dimension_numbers=dn2)
    proj = proj + bp[None, :, None, None]
    B, E, Hf, Wf = proj.shape
    return jnp.transpose(proj.reshape(B, E, Hf * Wf), (0, 2, 1))


if __name__ == "__main__":
    # Small shapes consistent with the module:
    #   B=2, in_chans=4, img=16x16, backbone stride-2 conv -> feature 8x8,
    #   feature_dim=32, embed_dim=128 (multiple of 128, like real ViT dims,
    #   so the output needs no lane depad).  num_patches=64 -> B*N = 128 rows.
    B, Cin, H, W = 2, 4, 16, 16
    patch = 2
    feature_dim, embed_dim = 32, 128

    key = jax.random.PRNGKey(0)
    k1, k2, k3, k4, k5 = jax.random.split(key, 5)
    x = jax.random.normal(k1, (B, Cin, H, W), dtype=jnp.float32)

    params = {
        "backbone_w": 0.1 * jax.random.normal(k2, (feature_dim, Cin, patch, patch),
                                              dtype=jnp.float32),
        "backbone_b": 0.1 * jax.random.normal(k3, (feature_dim,), dtype=jnp.float32),
        "proj_w": 0.1 * jax.random.normal(k4, (embed_dim, feature_dim, 1, 1),
                                          dtype=jnp.float32),
        "proj_b": 0.1 * jax.random.normal(k5, (embed_dim,), dtype=jnp.float32),
    }

    prepared = prepare_params(params, patch)        # one-time host weight fusion/layout
    fwd = jax.jit(lambda xx: hybrid_embed_forward(xx, prepared, patch=patch))

    out = jax.block_until_ready(fwd(x))
    assert out.shape == (B, (H // patch) * (W // patch), embed_dim), out.shape
    assert out.dtype == jnp.bfloat16

    ref = jax.block_until_ready(_reference_forward(x, params, patch=patch))
    # bf16 MXU inputs + bf16 output with f32 accumulation -> loosened tolerance
    assert jnp.allclose(out.astype(jnp.float32), ref, atol=2e-2, rtol=2e-2), \
        "mismatch vs reference"

    print("KERNEL_OK")
</pallas_src>

<mosaic_0001>
module attributes {stable_mosaic.version = 11 : i64} {
  func.func @_fused_embed_kernel(%arg0: i32, %arg1: memref<64x16xbf16, #tpu.memory_space<vmem>>, %arg2: memref<16x128xbf16, #tpu.memory_space<vmem>>, %arg3: memref<1x128xf32, #tpu.memory_space<vmem>>, %arg4: memref<64x128xbf16, #tpu.memory_space<vmem>>) attributes {dimension_semantics = [#tpu.dimension_semantics<parallel>], iteration_bounds = array<i64: 2>, scalar_prefetch = 0 : i64, scratch_operands = 0 : i64, tpu.core_type = #tpu.core_type<tc>, window_params = [{transform_indices = @transform_0, window_bounds = array<i64: 64, 16>}, {pipeline_mode = #tpu.pipeline_mode<synchronous>, transform_indices = @transform_1, window_bounds = array<i64: 16, 128>}, {pipeline_mode = #tpu.pipeline_mode<synchronous>, transform_indices = @transform_2, window_bounds = array<i64: 1, 128>}, {transform_indices = @transform_3, window_bounds = array<i64: 64, 128>}]} {
    %c0 = arith.constant 0 : index
    %c0_0 = arith.constant 0 : index
    %0 = vector.load %arg1[%c0, %c0_0] : memref<64x16xbf16, #tpu.memory_space<vmem>>, vector<64x16xbf16>
    %c0_1 = arith.constant 0 : index
    %c0_2 = arith.constant 0 : index
    %1 = vector.load %arg2[%c0_1, %c0_2] : memref<16x128xbf16, #tpu.memory_space<vmem>>, vector<16x128xbf16>
    %cst = arith.constant dense<0.000000e+00> : vector<64x128xf32>
    %2 = tpu.matmul %0, %1, %cst {dimension_numbers = #tpu.dot_dimension_numbers<[1], [0], [0], [1], [0, 0, 1, 1], [], []>} : vector<64x16xbf16>, vector<16x128xbf16>, vector<64x128xf32> -> vector<64x128xf32>
    %c0_3 = arith.constant 0 : index
    %c0_4 = arith.constant 0 : index
    %3 = vector.load %arg3[%c0_3, %c0_4] : memref<1x128xf32, #tpu.memory_space<vmem>>, vector<1x128xf32>
    %4 = vector.broadcast %3 : vector<1x128xf32> to vector<64x128xf32>
    %5 = arith.addf %2, %4 : vector<64x128xf32>
    %6 = arith.truncf %5 : vector<64x128xf32> to vector<64x128xbf16>
    %c0_5 = arith.constant 0 : index
    %c0_6 = arith.constant 0 : index
    %7 = vector.load %arg4[%c0_5, %c0_6] : memref<64x128xbf16, #tpu.memory_space<vmem>>, vector<64x128xbf16>
    tpu.vector_store %arg4[%c0_5, %c0_6], %6 {strides = array<i32>} : memref<64x128xbf16, #tpu.memory_space<vmem>>, vector<64x128xbf16>,
    return
  }
  func.func @transform_0(%arg0: i32) -> (i32, i32) {
    %c0_i32 = arith.constant 0 : i32
    %c0_i32_0 = arith.constant 0 : i32
    return %arg0, %c0_i32 : i32, i32
  }
  func.func @transform_1(%arg0: i32) -> (i32, i32) {
    %c0_i32 = arith.constant 0 : i32
    %c0_i32_0 = arith.constant 0 : i32
    %c0_i32_1 = arith.constant 0 : i32
    return %c0_i32, %c0_i32_0 : i32, i32
  }
  func.func @transform_2(%arg0: i32) -> (i32, i32) {
    %c0_i32 = arith.constant 0 : i32
    %c0_i32_0 = arith.constant 0 : i32
    %c0_i32_1 = arith.constant 0 : i32
    return %c0_i32, %c0_i32_0 : i32, i32
  }
  func.func @transform_3(%arg0: i32) -> (i32, i32) {
    %c0_i32 = arith.constant 0 : i32
    %c0_i32_0 = arith.constant 0 : i32
    return %arg0, %c0_i32 : i32, i32
  }
}

</mosaic_0001>

<bundles_post_ra>
// kernel: _lambda_.1
= control target key start
LH: loop header
LB: loop body
LE: loop exit
PB: predicated region body
PF: predicated region fallthrough
CT: control target
= control target key end

     0   :  { %8 = vsyncpa [#allocation3], 0  ;;  %s639_s0 = inlined_call_operand.vmem [shape: bf16[128,16], index: 0, kind: input, shape index: {}]   ;;  %s640_s1 = inlined_call_operand.vmem [shape: bf16[16,128], index: 1, kind: input, shape index: {}]   ;;  %s641_s2 = inlined_call_operand.vmem [shape: f32[1,128], index: 2, kind: input, shape index: {}]   ;;  %s642_s3 = inlined_call_operand.hbm [shape: bf16[128,128], index: 3, kind: output, shape index: {}]  }
   0x1   :  { %10 = vsyncpa [#allocation3 + $0x1], 0  ;;  %s545_s12 = smov 0   ;;  %s547_s13 = smov 0  }
   0x2   :  { %s549_s14 = smov 0   ;;  %s551_s15 = smov 0  }
   0x3 LB: > { %s566_s16 = sadd.s32 4294967295, %s521_s15   ;;  %s349_s17 = sadd.s32 4294967294, %s521_s15   ;;  %s521_s15 = sphi %s551_s15, %s648_s15   ;;  %s517_s14 = sphi %s549_s14, %s647_s14   ;;  %s513_s13 = sphi %s547_s13, %s646_s13   ;;  %s509_s12 = sphi %s545_s12, %s645_s12  }
   0x4   : > { %s570_s18 = sadd.s32 1, %s521_s15   ;;  %s91_s19 = sadd.s32 1, %s517_s14 }
   0x5   : > { %s88_s20 = ssub.s32 %s521_s15, %s570_s18  ;;  %p101_p0 = scmp.ne.s32.totalorder %s517_s14, %s513_s13 }
   0x6   : > { %p89_p1 = scmp.eq.s32.totalorder %s88_s20, 0  ;;  %p102_p2 = scmp.eq.s32.totalorder %s566_s16, 1 }
   0x7   : > { %p107_p3 = scmp.ne.s32.totalorder %s513_s13, %s509_s12  ;;  %p108_p4 = scmp.eq.s32.totalorder %s349_s17, 1 }
   0x8   : > { %s581_s21 = scalar_select %p89_p1, %s517_s14, %s91_s19  }
   0x9   : > { %p583_p5 = por %p102_p2, %p101_p0  ;;  %p587_p6 = por %p108_p4, %p107_p3 }
   0xa   : > { %p352_p7 = scmp.ge.s32.totalorder %s521_s15, 1  ;;  %p141_p8 = scmp.lt.s32.totalorder %s521_s15, 3 }
   0xc   : > { %p142_p9 = pnand %p352_p7, %p141_p8 }
   0xd   : > { %s354_s26 = sshll.u32 (!%p142_p9), %s566_s16, 3  ;;  %s162_s4 = sand.u32 (!%p142_p9), 1, %s513_s13  }
   0xe   : > { %145 = sbr.rel (%p142_p9) target bundleno = 173 (0xad), region = 32  ;;  %p166_p10 = scmp.lt.s32.totalorder (!%p142_p9), %s354_s26, 15 }
   0xf   : > { %s353_s7 = sshll.u32 (!%p142_p9), %s162_s4, 5  ;;  %s390_s8 = sshll.u32 (!%p142_p9), %s566_s16, 5 }
  0x10   : > { %s283_s11 = scalar_lea.hbm (!%p142_p9), %s642_s3, %s390_s8  ;;  %s164_s17 = scalar_lea.vmem (!%p142_p9), [#allocation2], %s353_s7 }
  0x11   : > { %s284_s19 = sshll.u32 (!%p142_p9), %s164_s17, 4  ;;  %s286_s20 = sshll.u32 (!%p142_p9), %s283_s11, 4  ;;  %s285_s19 = int_to_ptr.vmem [resolvable:$true] %s284_s19  ;;  %s287_s20 = int_to_ptr.hbm [resolvable:$true] %s286_s20 }
  0x12   : > { %s272_s16 = scalar_lea.sflag (!%p142_p9), [#allocation3], %s162_s4  ;;  %s473_s24 = sshra.s32 (!%p142_p9), %s287_s20, 4  ;;  %s474_s24 = int_to_ptr.hbm [resolvable:$true] %s473_s24 }
  0x13   : > { %v389_v0 = vld [vmem:[%s640_s1] sm:$0xff]  ;;  %s650_s26 = smov (!%p166_p10, %s354_s26), 15  ;;  %vm213_vm0 = vcmask 130048   ;;  %s475_s25 = scalar_lea.hbm %s474_s24, 32 }
  0x14   : > { %233 = vmatpush.bf16.msra.mxu0 %v389_v0  ;;  %414 = vmatpush.bf16.msra.mxu1 %v389_v0  ;;  %s355_s27 = sshll.u32 %s650_s26, 2  ;;  %v458_v7 = vld [vmem:[%s641_s2] ss:$0 sm:$0xff]  ;;  %p476_p11 = scmp.ne.s32.totalorder %s474_s24, %s475_s25 }
  0x15   : > { %415 = vmatpush.bf16.msra.mxu2 %v389_v0  ;;  %416 = vmatpush.bf16.msra.mxu3 %v389_v0  ;;  %s169_s30 = scalar_lea.vmem %s639_s0, %s355_s27  ;;  %s479_s28 = scalar_lea.hbm %s642_s3, 64 }
  0x16   : > { %v385_v1 = vld [vmem:[%s169_s30] sm:$0xff]  ;;  %v386_v2 = vld [vmem:[%s169_s30 + $0x8] sm:$0xff]  ;;  %v387_v3 = vld [vmem:[%s169_s30 + $0x10] sm:$0xff]  ;;  %p477_p12 = pnand %p476_p11, %p583_p5  ;;  %p480_p0 = scmp.lt.s32.totalorder %s474_s24, %s642_s3 }
  0x17   : > { %v388_v4 = vld [vmem:[%s169_s30 + $0x18] sm:$0xff]  ;;  %376 = vmatmul.msk.bf16.vlgmr.msra.gmra.mxu0 %vm213_vm0, %v385_v1  ;;  %377 = vmatmul.msk.bf16.vlgmr.msra.gmra.mxu1 %vm213_vm0, %v386_v2  ;;  %p481_p1 = scmp.lt.s32.totalorder %s479_s28, %s475_s25 }
  0x18   : > { %378 = vmatmul.msk.bf16.vlgmr.msra.gmra.mxu2 %vm213_vm0, %v387_v3  ;;  %379 = vmatmul.msk.bf16.vlgmr.msra.gmra.mxu3 %vm213_vm0, %v388_v4  ;;  %p478_p13 = pneg %p477_p12 }
  0x19   : > { %p482_p2 = por %p481_p1, %p480_p0 }
  0x1b   : > { %p483_p3 = pnand %p482_p2, %p478_p13 }
  0x94   : > { %v235_v5 = vpop.f32.mrf.mxu0  ;;  %v240_v6 = vpop.f32.mrf.mxu1 }
  0x95   : > { %v236_v12 = vadd.f32 %v458_v7, %v235_v5  ;;  %v241_v13 = vadd.f32 %v458_v7, %v240_v6 }
  0x9b   : > { %v245_v8 = vpop.f32.mrf.mxu2  ;;  %v250_v9 = vpop.f32.mrf.mxu3 }
  0x9c   : > { %v237_v10 = vpop.f32.mrf.mxu0  ;;  %v242_v11 = vpop.f32.mrf.mxu1  ;;  %v246_v20 = vadd.f32 %v458_v7, %v245_v8  ;;  %v251_v21 = vadd.f32 %v458_v7, %v250_v9 }
  0x9d   : > { %v238_v14 = vadd.f32 %v458_v7, %v237_v10  ;;  %v243_v15 = vadd.f32 %v458_v7, %v242_v11 }
  0x9f   : > { %v394_v16 = vpack.c.bf16 %v238_v14, %v236_v12  ;;  %v399_v17 = vpack.c.bf16 %v243_v15, %v241_v13 }
  0xa1   : > { %395 = vst [vmem:[%s164_s17] sm:$0xff] %v394_v16  }
  0xa2   : > { %411 = vst [vmem:[%s164_s17 + $0x8] sm:$0xff] %v399_v17  }
  0xa3   : > { %v247_v18 = vpop.f32.mrf.mxu2  ;;  %v252_v19 = vpop.f32.mrf.mxu3 }
  0xa4   : > { %v248_v22 = vadd.f32 %v458_v7, %v247_v18  ;;  %v253_v23 = vadd.f32 %v458_v7, %v252_v19 }
  0xa6   : > { %v404_v24 = vpack.c.bf16 %v248_v22, %v246_v20  ;;  %v409_v25 = vpack.c.bf16 %v253_v23, %v251_v21 }
  0xa8   : > { %412 = vst [vmem:[%s164_s17 + $0x10] sm:$0xff] %v404_v24  }
  0xa9   : > { %413 = vst [vmem:[%s164_s17 + $0x18] sm:$0xff] %v409_v25  }
  0xaa   : > { %486 = shalt.err (!%p483_p3)
}
  0xab   : > { %s523_s4 = smov 64   ;;  %s524_s5 = smov 4  }
  0xac   : > { %417 = dma.vmem_to_hbm [thread:$0]  (%p583_p5), %s285_s19, 512, %s287_s20, %s272_s16, %s523_s4, %s523_s4, %s524_s5  }
  0xad PF: > { %p423_p4 = scmp.ge.s32.totalorder %s521_s15, 2  ;;  %s301_s6 = sand.u32 1, %s509_s12  }
  0xae   : > { %s302_s7 = scalar_lea.sflag [#allocation3], %s301_s6 }
  0xaf   : > { %p420_p7 = pnand %p423_p4, %p587_p6 }
  0xb1   : > { %p421_p8 = pneg %p420_p7 }
  0xb3   : > { %504 = dma.done.wait (%p421_p8), %s302_s7, 512  }
  0xb4   : > { %506 = vsyncadd (%p421_p8), %s302_s7, 4294966784  ;;  %p13_p9 = scmp.ge.s32.totalorder %s570_s18, 4   ;;  %s645_s12 = smov %s513_s13 }
  0xb5   : > { %s646_s13 = smov %s517_s14  ;;  %s647_s14 = smov %s581_s21 }
  0xb6   : > { %s648_s15 = smov %s570_s18  ;;  %15 = sbr.rel (!%p13_p9) target bundleno = 3 (0x3), region = 67 }
  0xbb   :  { %308 = vsyncpa [#allocation3], 1 }
  0xbc   :  { %310 = vsyncpa [#allocation3 + $0x1], 1 }

</bundles_post_ra>
